<compile_context>
chip_gen: v7x
topology: tpu7x:2x2x1
jax: 0.10.0
libtpu: 0.0.40
codegen_flags: <defaults>
</compile_context>

<pallas_src>
import math
from typing import NamedTuple

import jax
import jax.numpy as jnp
from jax.experimental import pallas as pl
from jax.experimental.pallas import tpu as pltpu


def _round_up(x, m):
    return ((x + m - 1) // m) * m


def _largest_aligned_divisor(total, cap, align=128):
    """Largest multiple of `align` that divides `total` and is <= cap (>= align)."""
    cap = min(cap, total)
    cand = (cap // align) * align
    while cand >= align:
        if total % cand == 0:
            return cand
        cand -= align
    return align


def _vmem_capacity_bytes():
    """Physical VMEM per TensorCore; conservative 64 MiB fallback (v7x)."""
    try:
        info = pltpu.get_tpu_info()
        cap = getattr(info, "vmem_capacity_bytes", None)
        if cap:
            return int(cap)
    except Exception:
        pass
    return 64 * 1024 * 1024


class PreparedParams(NamedTuple):
    weight_t: jax.Array   # (d_p, c_p), compute dtype, zero-padded, pre-transposed
    bias2d: jax.Array     # (1, c_p), float32, zero-padded
    class_num: int
    feature_dim: int


def prepare_params(weight, bias, *, compute_dtype=jnp.bfloat16):
    """One-time prep (hoisted out of the hot path): cast, transpose, lane-pad."""
    c, d = weight.shape
    assert bias.shape == (c,)
    c_p = _round_up(c, 128)
    d_p = _round_up(d, 128)
    w_t = weight.astype(compute_dtype).T                      # (d, c)
    if (d_p, c_p) != (d, c):
        w_t = jnp.pad(w_t, ((0, d_p - d), (0, c_p - c)))      # zeros: no-op in matmul
    b = bias.astype(jnp.float32)
    if c_p != c:
        b = jnp.pad(b, (0, c_p - c))
    return PreparedParams(w_t, b.reshape(1, c_p), c, d)


def _linear_logits_kernel(feat_ref, w_ref, b_ref, out_ref):
    # feat_ref: (tm, tk)  w_ref: (tk, tn)  b_ref: (1, tn)  out_ref: (tm, tn) f32
    k = pl.program_id(2)
    prod = jnp.dot(feat_ref[...], w_ref[...], preferred_element_type=jnp.float32)

    @pl.when(k == 0)
    def _():
        out_ref[...] = prod + b_ref[...]          # store first partial + bias

    @pl.when(k > 0)
    def _():
        out_ref[...] += prod                      # f32 accumulate in resident block


def linear_logits(
    feat,
    weight=None,
    bias=None,
    label=None,
    training=True,
    *,
    prepared=None,
    compute_dtype=jnp.bfloat16,
    tn_max=1024,
    tk_max=1024,
):
    """Pallas implementation of LinearLogits.forward.

    `label` is accepted but unused (API parity); `training` does not change the
    computation. Pass `prepared=prepare_params(weight, bias)` to keep the weight
    pad/cast/transpose out of the per-call path.
    """
    del label, training  # forward returns identical logits either way

    if prepared is None:
        prepared = prepare_params(weight, bias, compute_dtype=compute_dtype)

    n, d = feat.shape
    assert d == prepared.feature_dim, "feature_dim mismatch"
    c = prepared.class_num
    w_t = prepared.weight_t
    bias2d = prepared.bias2d
    d_p, c_p = w_t.shape
    compute_dtype = w_t.dtype
    out_dtype = feat.dtype

    # ---------------- tile selection ----------------
    ein = jnp.dtype(compute_dtype).itemsize
    tk = _largest_aligned_divisor(d_p, tk_max)
    tn = _largest_aligned_divisor(c_p, tn_max)

    phys_vmem = _vmem_capacity_bytes()
    budget = min(int(phys_vmem * 0.75), 100 * 1024 * 1024)

    # Maximize tm (feat rows per step): weight (the dominant stream) is re-read
    # from HBM n_p/tm times, so push tm toward N_p under the VMEM budget.
    n_16 = _round_up(max(n, 1), 16)                     # bf16 packs 16 sublanes/vreg
    fixed_bytes = 2 * ein * tk * tn + 2 * 4 * tn        # dbl-buf weight + f32 bias
    per_row_bytes = 2 * ein * tk + 2 * 4 * tn           # dbl-buf feat row + f32 out row
    tm_cap = max(16, (budget - fixed_bytes) // per_row_bytes)
    tm = max(16, min(n_16, (tm_cap // 16) * 16))
    n_p = _round_up(n, tm)

    # v7x megacore: expose >= 2 tiles across the two "parallel" axes when possible.
    if (n_p // tm) * (c_p // tn) < 2 and tn > 128:
        tn = _largest_aligned_divisor(c_p, tn - 128)

    grid = (n_p // tm, c_p // tn, d_p // tk)

    # ---------------- per-call feat prep (small array) ----------------
    feat_c = feat.astype(compute_dtype)
    if (n_p, d_p) != (n, d):
        feat_c = jnp.pad(feat_c, ((0, n_p - n), (0, d_p - d)))

    # VMEM limit from the real double-buffered footprint (f32 output included).
    tile_bytes = (
        2 * ein * tm * tk        # feat (double-buffered, compute dtype)
        + 2 * ein * tk * tn      # weight (double-buffered, compute dtype)
        + 2 * 4 * tn             # bias (f32)
        + 2 * 4 * tm * tn        # output (f32, doubles as accumulator)
    )
    vmem_limit = int(
        min(
            max(tile_bytes + (4 << 20), 32 << 20),
            min(phys_vmem - (8 << 20), 100 << 20),
        )
    )

    out_p = pl.pallas_call(
        _linear_logits_kernel,
        out_shape=jax.ShapeDtypeStruct((n_p, c_p), jnp.float32),
        grid=grid,
        in_specs=[
            pl.BlockSpec((tm, tk), lambda i, j, k: (i, k)),   # feat tile
            pl.BlockSpec((tk, tn), lambda i, j, k: (k, j)),   # weight.T tile (D, C)
            pl.BlockSpec((1, tn), lambda i, j, k: (0, j)),    # bias tile
        ],
        out_specs=pl.BlockSpec((tm, tn), lambda i, j, k: (i, j)),
        compiler_params=pltpu.CompilerParams(
            dimension_semantics=("parallel", "parallel", "arbitrary"),
            vmem_limit_bytes=vmem_limit,
        ),
    )(feat_c, w_t, bias2d)

    out = out_p[:n, :c]
    if out_dtype != jnp.float32:
        out = out.astype(out_dtype)
    return out


def init_params(key, feature_dim, class_num):
    """weight: xavier_uniform_ over (class_num, feature_dim); bias: zeros."""
    kw, _ = jax.random.split(key)
    bound = math.sqrt(6.0 / (class_num + feature_dim))  # xavier uniform, gain=1
    weight = jax.random.uniform(
        kw, (class_num, feature_dim), minval=-bound, maxval=bound, dtype=jnp.float32
    )
    bias = jnp.zeros((class_num,), dtype=jnp.float32)
    return weight, bias


if __name__ == "__main__":
    key = jax.random.PRNGKey(0)
    k_feat, k_param, k_label = jax.random.split(key, 3)

    batch = 8
    feature_dim = 32
    class_num = 16

    feat = jax.random.normal(k_feat, (batch, feature_dim), dtype=jnp.float32)
    label = jax.random.randint(k_label, (batch,), 0, class_num, dtype=jnp.int32)
    weight, bias = init_params(k_param, feature_dim, class_num)

    prepared = prepare_params(weight, bias)  # hoisted out of the hot path
    logits = linear_logits(feat, label=label, training=True, prepared=prepared)
    jax.block_until_ready(logits)
    assert logits.shape == (batch, class_num)

    # Tight check against the same math with bf16 operands + f32 accumulation.
    fb = feat.astype(jnp.bfloat16).astype(jnp.float32)
    wb = weight.astype(jnp.bfloat16).astype(jnp.float32)
    ref_bf16 = fb @ wb.T + bias
    assert jnp.allclose(logits, ref_bf16, atol=1e-4, rtol=1e-4)
    # Loose check against the full-f32 reference (bf16 operand rounding only).
    ref_f32 = feat @ weight.T + bias
    assert jnp.allclose(logits, ref_f32, atol=5e-2, rtol=5e-2)

    # Larger, tile-exercising shape: multi-step K, non-128-multiple C/D padding,
    # and the megacore tn split (grid_i == 1).
    kf2, kw2 = jax.random.split(k_feat)
    n2, d2, c2 = 384, 1088, 1000
    feat2 = jax.random.normal(kf2, (n2, d2), dtype=jnp.float32)
    w2 = jax.random.normal(kw2, (c2, d2), dtype=jnp.float32) * 0.02
    b2 = jnp.linspace(-0.1, 0.1, c2, dtype=jnp.float32)
    prepared2 = prepare_params(w2, b2)
    out2 = linear_logits(feat2, prepared=prepared2)
    jax.block_until_ready(out2)
    ref2 = (
        feat2.astype(jnp.bfloat16).astype(jnp.float32)
        @ w2.astype(jnp.bfloat16).astype(jnp.float32).T
        + b2
    )
    assert out2.shape == (n2, c2)
    assert jnp.allclose(out2, ref2, atol=2e-3, rtol=2e-3)

    print("KERNEL_OK")
</pallas_src>

<mosaic_0001>
module attributes {stable_mosaic.version = 11 : i64} {
  func.func @_linear_logits_kernel(%arg0: i32, %arg1: i32, %arg2: i32, %arg3: memref<16x128xbf16, #tpu.memory_space<vmem>>, %arg4: memref<128x128xbf16, #tpu.memory_space<vmem>>, %arg5: memref<1x128xf32, #tpu.memory_space<vmem>>, %arg6: memref<16x128xf32, #tpu.memory_space<vmem>>) attributes {dimension_semantics = [#tpu.dimension_semantics<parallel>, #tpu.dimension_semantics<parallel>, #tpu.dimension_semantics<arbitrary>], iteration_bounds = array<i64: 1, 1, 1>, scalar_prefetch = 0 : i64, scratch_operands = 0 : i64, tpu.core_type = #tpu.core_type<tc>, window_params = [{transform_indices = @transform_0, window_bounds = array<i64: 16, 128>}, {transform_indices = @transform_1, window_bounds = array<i64: 128, 128>}, {transform_indices = @transform_2, window_bounds = array<i64: 1, 128>}, {transform_indices = @transform_3, window_bounds = array<i64: 16, 128>}]} {
    %c0 = arith.constant 0 : index
    %c0_0 = arith.constant 0 : index
    %0 = vector.load %arg3[%c0, %c0_0] : memref<16x128xbf16, #tpu.memory_space<vmem>>, vector<16x128xbf16>
    %c0_1 = arith.constant 0 : index
    %c0_2 = arith.constant 0 : index
    %1 = vector.load %arg4[%c0_1, %c0_2] : memref<128x128xbf16, #tpu.memory_space<vmem>>, vector<128x128xbf16>
    %cst = arith.constant dense<0.000000e+00> : vector<16x128xf32>
    %2 = tpu.matmul %0, %1, %cst {dimension_numbers = #tpu.dot_dimension_numbers<[1], [0], [0], [1], [0, 0, 1, 1], [], []>} : vector<16x128xbf16>, vector<128x128xbf16>, vector<16x128xf32> -> vector<16x128xf32>
    %c0_i32 = arith.constant 0 : i32
    %3 = arith.cmpi eq, %arg2, %c0_i32 : i32
    %4 = arith.extui %3 : i1 to i32
    %c0_i32_3 = arith.constant 0 : i32
    %5 = arith.cmpi ne, %4, %c0_i32_3 : i32
    scf.if %5 {
      %c0_6 = arith.constant 0 : index
      %c0_7 = arith.constant 0 : index
      %9 = vector.load %arg5[%c0_6, %c0_7] : memref<1x128xf32, #tpu.memory_space<vmem>>, vector<1x128xf32>
      %10 = vector.broadcast %9 : vector<1x128xf32> to vector<16x128xf32>
      %11 = arith.addf %2, %10 : vector<16x128xf32>
      %c0_8 = arith.constant 0 : index
      %c0_9 = arith.constant 0 : index
      %12 = vector.load %arg6[%c0_8, %c0_9] : memref<16x128xf32, #tpu.memory_space<vmem>>, vector<16x128xf32>
      tpu.vector_store %arg6[%c0_8, %c0_9], %11 {strides = array<i32>} : memref<16x128xf32, #tpu.memory_space<vmem>>, vector<16x128xf32>,
    } else {
    }
    %c0_i32_4 = arith.constant 0 : i32
    %6 = arith.cmpi sgt, %arg2, %c0_i32_4 : i32
    %7 = arith.extui %6 : i1 to i32
    %c0_i32_5 = arith.constant 0 : i32
    %8 = arith.cmpi ne, %7, %c0_i32_5 : i32
    scf.if %8 {
      %c0_6 = arith.constant 0 : index
      %c0_7 = arith.constant 0 : index
      %9 = vector.load %arg6[%c0_6, %c0_7] : memref<16x128xf32, #tpu.memory_space<vmem>>, vector<16x128xf32>
      %10 = arith.addf %9, %2 : vector<16x128xf32>
      %c0_8 = arith.constant 0 : index
      %c0_9 = arith.constant 0 : index
      %11 = vector.load %arg6[%c0_8, %c0_9] : memref<16x128xf32, #tpu.memory_space<vmem>>, vector<16x128xf32>
      tpu.vector_store %arg6[%c0_8, %c0_9], %10 {strides = array<i32>} : memref<16x128xf32, #tpu.memory_space<vmem>>, vector<16x128xf32>,
    } else {
    }
    return
  }
  func.func @transform_0(%arg0: i32, %arg1: i32, %arg2: i32) -> (i32, i32) {
    %c0_i32 = arith.constant 0 : i32
    return %arg0, %arg2 : i32, i32
  }
  func.func @transform_1(%arg0: i32, %arg1: i32, %arg2: i32) -> (i32, i32) {
    %c0_i32 = arith.constant 0 : i32
    return %arg2, %arg1 : i32, i32
  }
  func.func @transform_2(%arg0: i32, %arg1: i32, %arg2: i32) -> (i32, i32) {
    %c0_i32 = arith.constant 0 : i32
    %c0_i32_0 = arith.constant 0 : i32
    return %c0_i32, %arg1 : i32, i32
  }
  func.func @transform_3(%arg0: i32, %arg1: i32, %arg2: i32) -> (i32, i32) {
    %c0_i32 = arith.constant 0 : i32
    return %arg0, %arg1 : i32, i32
  }
}

</mosaic_0001>

<bundles_post_ra>
// kernel: tpu_custom_call.1
= control target key start
LH: loop header
LB: loop body
LE: loop exit
PB: predicated region body
PF: predicated region fallthrough
CT: control target
= control target key end

     0   :  { %8 = vsyncpa [#allocation3], 0  ;;  %s397_s0 = inlined_call_operand.hbm [shape: bf16[16,128], index: 0, kind: input, shape index: {}]   ;;  %s398_s1 = inlined_call_operand.hbm [shape: bf16[128,128], index: 1, kind: input, shape index: {}]   ;;  %s399_s2 = inlined_call_operand.vmem [shape: f32[1,128], index: 2, kind: input, shape index: {}]   ;;  %s400_s3 = inlined_call_operand.hbm [shape: f32[16,128], index: 3, kind: output, shape index: {}]  }
   0x1   :  { %9 = vsyncpa [#allocation6], 0 }
   0x2   :  { %10 = vsyncpa [#allocation4], 0  ;;  %s329_s12 = smov [#allocation2]   ;;  %s257_s16 = scalar_lea.hbm %s397_s0, 128 }
   0x3   :  { %s16_s13 = sshll.u32 %s329_s12, 4  ;;  %p258_p0 = scmp.ne.s32.totalorder %s397_s0, %s257_s16  ;;  %s17_s13 = int_to_ptr.vmem [resolvable:$true] %s16_s13 }
   0x4   :  { %p261_p1 = scmp.lt.u32.totalorder %s257_s16, %s397_s0 }
   0x6   :  { %p263_p2 = pnand %p261_p1, %p258_p0 }
   0x8   :  { %266 = shalt.err (!%p263_p2)
}
   0x9   :  { %s267_s21 = scalar_lea.vmem %s17_s13, 128  ;;  %p272_p4 = scmp.lt.s32.totalorder %s17_s13, %s17_s13 }
   0xa   :  { %p268_p3 = scmp.ne.s32.totalorder %s17_s13, %s267_s21  ;;  %p273_p5 = scmp.lt.s32.totalorder %s267_s21, %s267_s21 }
   0xc   :  { %p274_p6 = por %p273_p5, %p272_p4 }
   0xe   :  { %p275_p7 = pnand %p274_p6, %p268_p3 }
  0x10   :  { %278 = shalt.err (!%p275_p7)
}
  0x11   :  { %s330_s22 = smov 64   ;;  %s331_s23 = smov 4  }
  0x12   :  { %22 = dma.hbm_to_vmem [thread:$0]  %s397_s0, 128, %s17_s13, [#allocation3], %s330_s22, %s330_s22, %s331_s23  }
  0x13   :  { %s332_s26 = smov [#allocation5]   ;;  %s279_s30 = scalar_lea.hbm %s398_s1, 1024 }
  0x14   :  { %s28_s27 = sshll.u32 %s332_s26, 4  ;;  %p280_p8 = scmp.ne.s32.totalorder %s398_s1, %s279_s30  ;;  %s29_s27 = int_to_ptr.vmem [resolvable:$true] %s28_s27 }
  0x15   :  { %p283_p9 = scmp.lt.u32.totalorder %s279_s30, %s398_s1 }
  0x17   :  { %p285_p10 = pnand %p283_p9, %p280_p8 }
  0x19   :  { %288 = shalt.err (!%p285_p10)
}
  0x1a   :  { %s289_s8 = scalar_lea.vmem %s29_s27, 1024  ;;  %p294_p12 = scmp.lt.s32.totalorder %s29_s27, %s29_s27 }
  0x1b   :  { %p290_p11 = scmp.ne.s32.totalorder %s29_s27, %s289_s8  ;;  %p295_p13 = scmp.lt.s32.totalorder %s289_s8, %s289_s8 }
  0x1d   :  { %p296_p0 = por %p295_p13, %p294_p12 }
  0x1f   :  { %p297_p1 = pnand %p296_p0, %p290_p11 }
  0x21   :  { %300 = shalt.err (!%p297_p1)
}
  0x22   :  { %34 = dma.hbm_to_vmem [thread:$0]  %s398_s1, 1024, %s29_s27, [#allocation6], %s330_s22, %s330_s22, %s331_s23  }
  0x23   :  { %323 = dma.done.wait [#allocation3], 128  }
  0x24   :  { %324 = vsyncadd [#allocation3], 4294967168 }
  0x25   :  { %325 = dma.done.wait [#allocation6], 1024  }
  0x26   :  { %326 = vsyncadd [#allocation6], 4294966272  ;;  %v333_v0 = vmov 0.0   ;;  %vm334_vm0 = vmmov 0   ;;  %v248_v1 = vld [vmem:[#allocation5] sm:$0xff]   ;;  %v249_v2 = vld [vmem:[#allocation5 + $0x8] sm:$0xff]  }
  0x27   :  { %219 = vmatprep.subr.bf16.mxu0 %v333_v0  ;;  %235 = vmatprep.mubr.msk.bf16.mxu0 %vm334_vm0, %v333_v0  ;;  %v250_v3 = vld [vmem:[#allocation5 + $0x10] sm:$0xff]   ;;  %v251_v4 = vld [vmem:[#allocation5 + $0x18] sm:$0xff]   ;;  %v252_v5 = vld [vmem:[#allocation5 + $0x20] sm:$0xff]   ;;  %s335_s11 = smov [#allocation7]  }
  0x28   :  { %220 = vmatpush3.bf16.msra.mxu0 %v248_v1  ;;  %v253_v6 = vld [vmem:[#allocation5 + $0x28] sm:$0xff]   ;;  %v254_v7 = vld [vmem:[#allocation5 + $0x30] sm:$0xff]   ;;  %v255_v8 = vld [vmem:[#allocation5 + $0x38] sm:$0xff]   ;;  %s187_s12 = sshll.u32 %s335_s11, 4  ;;  %s188_s12 = int_to_ptr.vmem [resolvable:$true] %s187_s12 }
  0x29   :  { %221 = vmatprep.subr.bf16.mxu0 %v333_v0  ;;  %v256_v9 = vld [vmem:[#allocation2] sm:$0xff]   ;;  %s301_s13 = scalar_lea.vmem %s188_s12, 256  ;;  %p306_p3 = scmp.lt.s32.totalorder %s188_s12, %s188_s12 }
  0x2a   :  { %v209_v10 = vld [vmem:[%s399_s2] ss:$0 sm:$0xff]  ;;  %p302_p2 = scmp.ne.s32.totalorder %s188_s12, %s301_s13  ;;  %p307_p4 = scmp.lt.s32.totalorder %s301_s13, %s301_s13 }
  0x2c   :  { %222 = vmatpush3.bf16.msra.mxu0 %v249_v2  ;;  %p308_p5 = por %p307_p4, %p306_p3 }
  0x2d   :  { %223 = vmatprep.subr.bf16.mxu0 %v333_v0 }
  0x2e   :  { %p309_p6 = pnand %p308_p5, %p302_p2 }
  0x30   :  { %224 = vmatpush3.bf16.msra.mxu0 %v250_v3 }
  0x31   :  { %225 = vmatprep.subr.bf16.mxu0 %v333_v0 }
  0x34   :  { %226 = vmatpush3.bf16.msra.mxu0 %v251_v4 }
  0x35   :  { %227 = vmatprep.subr.bf16.mxu0 %v333_v0 }
  0x38   :  { %228 = vmatpush3.bf16.msra.mxu0 %v252_v5 }
  0x39   :  { %229 = vmatprep.subr.bf16.mxu0 %v333_v0 }
  0x3c   :  { %230 = vmatpush3.bf16.msra.mxu0 %v253_v6 }
  0x3d   :  { %231 = vmatprep.subr.bf16.mxu0 %v333_v0 }
  0x40   :  { %232 = vmatpush3.bf16.msra.mxu0 %v254_v7 }
  0x41   :  { %233 = vmatprep.subr.bf16.mxu0 %v333_v0 }
  0x44   :  { %234 = vmatpush3.bf16.msra.mxu0 %v255_v8 }
  0x47   :  { %236 = vmatmul.mubr.bf16.vlgmr.msra.gmra.mrb[0].mxu0 %v256_v9 }
 0x11a   :  { %v150_v11 = vpop.f32.mrb[0].mxu0 }
 0x11b   :  { %v168_v12 = vadd.f32 %v209_v10, %v150_v11  ;;  %v237_v13 = vpop.f32.mrb[1].mxu0 }
 0x11c   :  { %v153_v14 = vpop.f32.mrb[2].mxu0 }
 0x11d   :  { %170 = vst [vmem:[#allocation7] sm:$0xff] %v168_v12  ;;  %v169_v15 = vadd.f32 %v209_v10, %v153_v14  ;;  %v238_v16 = vpop.f32.mrb[3].mxu0 }
 0x11f   :  { %171 = vst [vmem:[#allocation7 + $0x8] sm:$0xff] %v169_v15 }
 0x120   :  { %312 = shalt.err (!%p309_p6)
}
 0x121   :  { %s313_s15 = scalar_lea.hbm %s400_s3, 256 }
 0x122   :  { %p314_p7 = scmp.ne.s32.totalorder %s400_s3, %s313_s15  ;;  %p317_p8 = scmp.lt.u32.totalorder %s313_s15, %s400_s3 }
 0x124   :  { %p319_p9 = pnand %p317_p8, %p314_p7 }
 0x126   :  { %322 = shalt.err (!%p319_p9)
}
 0x127   :  { %s336_s20 = smov 128   ;;  %s337_s21 = smov 8  }
 0x128   :  { %193 = dma.vmem_to_hbm [thread:$0]  %s188_s12, 256, %s400_s3, [#allocation4], %s336_s20, %s336_s20, %s337_s21  }
 0x129   :  { %327 = dma.done.wait [#allocation4], 256  }
 0x12a   :  { %328 = vsyncadd [#allocation4], 4294967040 }
 0x12b   :  { %197 = vsyncpa [#allocation3], 1 }
 0x12c   :  { %198 = vsyncpa [#allocation6], 1 }
 0x12d   :  { %199 = vsyncpa [#allocation4], 1 }

</bundles_post_ra>
